<compile_context>
chip_gen: v6e
topology: v6e:2x2x1
jax: 0.10.0
libtpu: 0.0.40
codegen_flags: <defaults>
</compile_context>

<pallas_src>
import functools

import jax
import jax.numpy as jnp
import numpy as np
from jax import lax
from jax.experimental import pallas as pl
from jax.experimental.pallas import tpu as pltpu


def _fused_conv_bn_relu_kernel(x_ref, w_ref, mask_ref, gamma_ref, beta_ref,
                               y_ref, col_ref, *,
                               N, Cin, Cout, H, W, Wp, KH, KW, M_pad, eps):
    """Fused 'same' conv (stride 1) + training-mode BN + ReLU, single invocation.

    Shapes (all f32; channels on sublanes, flattened spatial on lanes):
      x_ref    : (N, Cin, L)          padded input, spatially flattened, L >= M_pad
      w_ref    : (Cout, KH*KW*Cin)    k = (kh*KW + kw)*Cin + cin
      mask_ref : (1, N*M_pad)         1.0 on valid flat positions, 0.0 on pad/garbage
      gamma_ref, beta_ref : (Cout, 1)
      y_ref    : (N, Cout, M_pad)     strided output; wrapper drops pad columns
      col_ref  : (KH*KW*Cin, N*M_pad) batched im2col scratch
    """
    # ---- Batched im2col: one aligned load per image, taps derived via XLU rolls. ----
    for n in range(N):                                   # N is tiny -> static unroll is fine
        base = n * M_pad
        chunk = x_ref[n, :, :M_pad]                      # (Cin, M_pad), lane-aligned load
        for kh in range(KH):
            for kw in range(KW):
                tap = kh * KW + kw
                s = kh * Wp + kw
                if s == 0:
                    val = chunk
                else:
                    # rolled[q] = chunk[(q + s) % M_pad].  For every valid output column q
                    # (q % Wp < W, q < H*Wp) we have q + s < M_pad (asserted in the wrapper),
                    # so the wrap-around only touches columns that are masked from the BN
                    # stats and sliced off by the wrapper.
                    val = pltpu.roll(chunk, shift=(M_pad - s) % M_pad, axis=1)
                col_ref[tap * Cin:(tap + 1) * Cin, base:base + M_pad] = val

    # ---- One MXU matmul for the whole batch. ----
    conv = jnp.dot(w_ref[...], col_ref[...],
                   preferred_element_type=jnp.float32)   # (Cout, N*M_pad), lane-dense

    # ---- Training-mode BN stats over valid columns (two-pass / centered variance). ----
    mask = mask_ref[...]                                 # (1, N*M_pad)
    inv_count = 1.0 / float(N * H * W)
    mean = (conv * mask).sum(axis=1, keepdims=True) * inv_count        # (Cout, 1)
    centered = (conv - mean) * mask
    var = (centered * centered).sum(axis=1, keepdims=True) * inv_count  # biased, like PyTorch
    scale = gamma_ref[...] * lax.rsqrt(var + eps)                       # (Cout, 1)
    shift = beta_ref[...] - mean * scale

    # ---- BN + ReLU, then lane-aligned per-image stores (M_pad is a multiple of 128). ----
    yv = jnp.maximum(conv * scale + shift, 0.0)          # (Cout, N*M_pad)
    for n in range(N):
        y_ref[n] = yv[:, n * M_pad:(n + 1) * M_pad]


def conv_batchnorm_relu(x_nchw, w_oihw, bias, gamma, beta, eps=1e-5):
    # `bias` is accepted for API parity with the PyTorch module but intentionally unused:
    # training-mode BatchNorm subtracts the batch mean, which cancels a pre-BN per-channel
    # constant exactly.  (If reused with eval-mode/running-stats BN, re-add the bias.)
    del bias

    N, Cin, H, W = x_nchw.shape
    Cout, _, KH, KW = w_oihw.shape

    # PyTorch 'same' padding for stride 1: total K-1, extra pad on the high side.
    ph, pw = KH - 1, KW - 1
    ph_lo, pw_lo = ph // 2, pw // 2
    Wp = W + pw
    M = H * Wp                                   # flat 'strided' output length per image
    K = KH * KW * Cin

    # Lane-dense flat width: multiple of 128, and big enough that no valid output column's
    # tap read (q + s, s = kh*Wp + kw) wraps around the rolled chunk.
    max_valid_q = (H - 1) * Wp + (W - 1)
    s_max = (KH - 1) * Wp + (KW - 1)
    M_pad = ((max(M, max_valid_q + s_max + 1) + 127) // 128) * 128
    assert M_pad >= M and max_valid_q + s_max < M_pad, \
        "roll-based im2col requires the wrap-around to land only in garbage columns"

    # Single pad: widen by pw and add enough bottom rows that the flattened length covers
    # both the padded image and the per-image M_pad-wide chunk load (no second flat pad).
    L_need = max(M_pad, (H + ph) * Wp)
    Hp2 = -(-L_need // Wp)                       # ceil
    pad_bottom = Hp2 - H - ph_lo
    assert pad_bottom >= ph - ph_lo
    L = Hp2 * Wp

    x = x_nchw.astype(jnp.float32)
    x_pad = jnp.pad(x, ((0, 0), (0, 0), (ph_lo, pad_bottom), (pw_lo, pw - pw_lo)))
    x_flat = x_pad.reshape(N, Cin, L)

    # Weights: OIHW -> (Cout, KH, KW, Cin) -> (Cout, KH*KW*Cin); k = (kh*KW+kw)*Cin + cin.
    w_flat = jnp.transpose(w_oihw.astype(jnp.float32), (0, 2, 3, 1)).reshape(Cout, K)

    # Valid-column mask for the batched strided flat output.
    q = jnp.arange(M_pad, dtype=jnp.int32)
    mask1 = ((q < M) & (q % Wp < W)).astype(jnp.float32)
    mask = jnp.tile(mask1, (N,)).reshape(1, N * M_pad)

    gamma2 = gamma.astype(jnp.float32).reshape(Cout, 1)
    beta2 = beta.astype(jnp.float32).reshape(Cout, 1)

    # Single grid step: whole batch fits easily in VMEM (~170 KB here).
    y_flat = pl.pallas_call(
        functools.partial(_fused_conv_bn_relu_kernel, N=N, Cin=Cin, Cout=Cout,
                          H=H, W=W, Wp=Wp, KH=KH, KW=KW, M_pad=M_pad, eps=eps),
        out_shape=jax.ShapeDtypeStruct((N, Cout, M_pad), jnp.float32),
        grid_spec=pltpu.PrefetchScalarGridSpec(
            num_scalar_prefetch=0,
            grid=(1,),
            in_specs=[
                pl.BlockSpec((N, Cin, L), lambda i: (0, 0, 0)),
                pl.BlockSpec((Cout, K), lambda i: (0, 0)),
                pl.BlockSpec((1, N * M_pad), lambda i: (0, 0)),
                pl.BlockSpec((Cout, 1), lambda i: (0, 0)),
                pl.BlockSpec((Cout, 1), lambda i: (0, 0)),
            ],
            out_specs=pl.BlockSpec((N, Cout, M_pad), lambda i: (0, 0, 0)),
            scratch_shapes=[pltpu.VMEM((K, N * M_pad), jnp.float32)],
        ),
        compiler_params=pltpu.CompilerParams(dimension_semantics=("arbitrary",)),
    )(x_flat, w_flat, mask, gamma2, beta2)

    # (N, Cout, M_pad) -> drop lane padding -> (N, Cout, H, Wp) -> drop pad columns -> NCHW.
    return y_flat[:, :, :M].reshape(N, Cout, H, Wp)[:, :, :, :W]


def reference(x_nchw, w_oihw, bias, gamma, beta, eps=1e-5):
    x = jnp.transpose(x_nchw, (0, 2, 3, 1))
    w = jnp.transpose(w_oihw, (2, 3, 1, 0))
    conv = jax.lax.conv_general_dilated(
        x, w, window_strides=(1, 1), padding="SAME",
        dimension_numbers=("NHWC", "HWIO", "NHWC")) + bias
    mean = conv.mean(axis=(0, 1, 2))
    var = conv.var(axis=(0, 1, 2))
    y = (conv - mean) * jax.lax.rsqrt(var + eps) * gamma + beta
    return jnp.transpose(jnp.maximum(y, 0.0), (0, 3, 1, 2))


if __name__ == "__main__":
    key = jax.random.PRNGKey(0)
    k1, k2, k3, k4, k5 = jax.random.split(key, 5)

    # Small shapes implied by the module: num_in_filters=4 -> num_out_filters=8, 3x3 kernel.
    N, Cin, H, W = 2, 4, 16, 16
    Cout, KH, KW = 8, 3, 3

    x = jax.random.normal(k1, (N, Cin, H, W), jnp.float32)
    fan_in = Cin * KH * KW
    bound = 1.0 / np.sqrt(fan_in)
    w = jax.random.uniform(k2, (Cout, Cin, KH, KW), jnp.float32, -bound, bound)
    b = jax.random.uniform(k3, (Cout,), jnp.float32, -bound, bound)
    gamma = 1.0 + 0.1 * jax.random.normal(k4, (Cout,), jnp.float32)
    beta = 0.1 * jax.random.normal(k5, (Cout,), jnp.float32)

    y = conv_batchnorm_relu(x, w, b, gamma, beta)
    y = jax.block_until_ready(y)

    y_ref = reference(x, w, b, gamma, beta)
    assert y.shape == (N, Cout, H, W)
    np.testing.assert_allclose(np.asarray(y), np.asarray(y_ref), rtol=1e-4, atol=1e-4)
    print("KERNEL_OK")
</pallas_src>

<mosaic_0001>
module attributes {stable_mosaic.version = 11 : i64} {
  func.func @_fused_conv_bn_relu_kernel(%arg0: i32, %arg1: memref<2x4x396xf32, #tpu.memory_space<vmem>>, %arg2: memref<8x36xf32, #tpu.memory_space<vmem>>, %arg3: memref<1x768xf32, #tpu.memory_space<vmem>>, %arg4: memref<8x1xf32, #tpu.memory_space<vmem>>, %arg5: memref<8x1xf32, #tpu.memory_space<vmem>>, %arg6: memref<2x8x384xf32, #tpu.memory_space<vmem>>, %arg7: memref<36x768xf32, #tpu.memory_space<vmem>>) attributes {dimension_semantics = [#tpu.dimension_semantics<arbitrary>], iteration_bounds = array<i64: 1>, scalar_prefetch = 0 : i64, scratch_operands = 1 : i64, tpu.core_type = #tpu.core_type<tc>, window_params = [{pipeline_mode = #tpu.pipeline_mode<synchronous>, transform_indices = @transform_0, window_bounds = array<i64: 2, 4, 396>}, {pipeline_mode = #tpu.pipeline_mode<synchronous>, transform_indices = @transform_1, window_bounds = array<i64: 8, 36>}, {pipeline_mode = #tpu.pipeline_mode<synchronous>, transform_indices = @transform_2, window_bounds = array<i64: 1, 768>}, {pipeline_mode = #tpu.pipeline_mode<synchronous>, transform_indices = @transform_3, window_bounds = array<i64: 8, 1>}, {pipeline_mode = #tpu.pipeline_mode<synchronous>, transform_indices = @transform_4, window_bounds = array<i64: 8, 1>}, {pipeline_mode = #tpu.pipeline_mode<synchronous>, transform_indices = @transform_5, window_bounds = array<i64: 2, 8, 384>}]} {
    %c0 = arith.constant 0 : index
    %c0_0 = arith.constant 0 : index
    %c0_1 = arith.constant 0 : index
    %0 = vector.load %arg1[%c0, %c0_0, %c0_1] : memref<2x4x396xf32, #tpu.memory_space<vmem>>, vector<1x4x384xf32>
    %1 = vector.shape_cast %0 : vector<1x4x384xf32> to vector<4x384xf32>
    %c0_2 = arith.constant 0 : index
    %c0_3 = arith.constant 0 : index
    %2 = vector.load %arg7[%c0_2, %c0_3] : memref<36x768xf32, #tpu.memory_space<vmem>>, vector<4x384xf32>
    tpu.vector_store %arg7[%c0_2, %c0_3], %1 {strides = array<i32>} : memref<36x768xf32, #tpu.memory_space<vmem>>, vector<4x384xf32>,
    %c383_i32 = arith.constant 383 : i32
    %3 = tpu.dynamic_rotate %1 by %c383_i32 dim 1 : vector<4x384xf32>, i32 -> vector<4x384xf32>
    %c4 = arith.constant 4 : index
    %c0_4 = arith.constant 0 : index
    %4 = vector.load %arg7[%c4, %c0_4] : memref<36x768xf32, #tpu.memory_space<vmem>>, vector<4x384xf32>
    tpu.vector_store %arg7[%c4, %c0_4], %3 {strides = array<i32>} : memref<36x768xf32, #tpu.memory_space<vmem>>, vector<4x384xf32>,
    %c382_i32 = arith.constant 382 : i32
    %5 = tpu.dynamic_rotate %1 by %c382_i32 dim 1 : vector<4x384xf32>, i32 -> vector<4x384xf32>
    %c8 = arith.constant 8 : index
    %c0_5 = arith.constant 0 : index
    %6 = vector.load %arg7[%c8, %c0_5] : memref<36x768xf32, #tpu.memory_space<vmem>>, vector<4x384xf32>
    tpu.vector_store %arg7[%c8, %c0_5], %5 {strides = array<i32>} : memref<36x768xf32, #tpu.memory_space<vmem>>, vector<4x384xf32>,
    %c366_i32 = arith.constant 366 : i32
    %7 = tpu.dynamic_rotate %1 by %c366_i32 dim 1 : vector<4x384xf32>, i32 -> vector<4x384xf32>
    %c12 = arith.constant 12 : index
    %c0_6 = arith.constant 0 : index
    %8 = vector.load %arg7[%c12, %c0_6] : memref<36x768xf32, #tpu.memory_space<vmem>>, vector<4x384xf32>
    tpu.vector_store %arg7[%c12, %c0_6], %7 {strides = array<i32>} : memref<36x768xf32, #tpu.memory_space<vmem>>, vector<4x384xf32>,
    %c365_i32 = arith.constant 365 : i32
    %9 = tpu.dynamic_rotate %1 by %c365_i32 dim 1 : vector<4x384xf32>, i32 -> vector<4x384xf32>
    %c16 = arith.constant 16 : index
    %c0_7 = arith.constant 0 : index
    %10 = vector.load %arg7[%c16, %c0_7] : memref<36x768xf32, #tpu.memory_space<vmem>>, vector<4x384xf32>
    tpu.vector_store %arg7[%c16, %c0_7], %9 {strides = array<i32>} : memref<36x768xf32, #tpu.memory_space<vmem>>, vector<4x384xf32>,
    %c364_i32 = arith.constant 364 : i32
    %11 = tpu.dynamic_rotate %1 by %c364_i32 dim 1 : vector<4x384xf32>, i32 -> vector<4x384xf32>
    %c20 = arith.constant 20 : index
    %c0_8 = arith.constant 0 : index
    %12 = vector.load %arg7[%c20, %c0_8] : memref<36x768xf32, #tpu.memory_space<vmem>>, vector<4x384xf32>
    tpu.vector_store %arg7[%c20, %c0_8], %11 {strides = array<i32>} : memref<36x768xf32, #tpu.memory_space<vmem>>, vector<4x384xf32>,
    %c348_i32 = arith.constant 348 : i32
    %13 = tpu.dynamic_rotate %1 by %c348_i32 dim 1 : vector<4x384xf32>, i32 -> vector<4x384xf32>
    %c24 = arith.constant 24 : index
    %c0_9 = arith.constant 0 : index
    %14 = vector.load %arg7[%c24, %c0_9] : memref<36x768xf32, #tpu.memory_space<vmem>>, vector<4x384xf32>
    tpu.vector_store %arg7[%c24, %c0_9], %13 {strides = array<i32>} : memref<36x768xf32, #tpu.memory_space<vmem>>, vector<4x384xf32>,
    %c347_i32 = arith.constant 347 : i32
    %15 = tpu.dynamic_rotate %1 by %c347_i32 dim 1 : vector<4x384xf32>, i32 -> vector<4x384xf32>
    %c28 = arith.constant 28 : index
    %c0_10 = arith.constant 0 : index
    %16 = vector.load %arg7[%c28, %c0_10] : memref<36x768xf32, #tpu.memory_space<vmem>>, vector<4x384xf32>
    tpu.vector_store %arg7[%c28, %c0_10], %15 {strides = array<i32>} : memref<36x768xf32, #tpu.memory_space<vmem>>, vector<4x384xf32>,
    %c346_i32 = arith.constant 346 : i32
    %17 = tpu.dynamic_rotate %1 by %c346_i32 dim 1 : vector<4x384xf32>, i32 -> vector<4x384xf32>
    %c32 = arith.constant 32 : index
    %c0_11 = arith.constant 0 : index
    %18 = vector.load %arg7[%c32, %c0_11] : memref<36x768xf32, #tpu.memory_space<vmem>>, vector<4x384xf32>
    tpu.vector_store %arg7[%c32, %c0_11], %17 {strides = array<i32>} : memref<36x768xf32, #tpu.memory_space<vmem>>, vector<4x384xf32>,
    %c1 = arith.constant 1 : index
    %c0_12 = arith.constant 0 : index
    %c0_13 = arith.constant 0 : index
    %19 = vector.load %arg1[%c1, %c0_12, %c0_13] : memref<2x4x396xf32, #tpu.memory_space<vmem>>, vector<1x4x384xf32>
    %20 = vector.shape_cast %19 : vector<1x4x384xf32> to vector<4x384xf32>
    %c0_14 = arith.constant 0 : index
    %c384 = arith.constant 384 : index
    %21 = vector.load %arg7[%c0_14, %c384] : memref<36x768xf32, #tpu.memory_space<vmem>>, vector<4x384xf32>
    tpu.vector_store %arg7[%c0_14, %c384], %20 {strides = array<i32>} : memref<36x768xf32, #tpu.memory_space<vmem>>, vector<4x384xf32>,
    %c383_i32_15 = arith.constant 383 : i32
    %22 = tpu.dynamic_rotate %20 by %c383_i32_15 dim 1 : vector<4x384xf32>, i32 -> vector<4x384xf32>
    %c4_16 = arith.constant 4 : index
    %c384_17 = arith.constant 384 : index
    %23 = vector.load %arg7[%c4_16, %c384_17] : memref<36x768xf32, #tpu.memory_space<vmem>>, vector<4x384xf32>
    tpu.vector_store %arg7[%c4_16, %c384_17], %22 {strides = array<i32>} : memref<36x768xf32, #tpu.memory_space<vmem>>, vector<4x384xf32>,
    %c382_i32_18 = arith.constant 382 : i32
    %24 = tpu.dynamic_rotate %20 by %c382_i32_18 dim 1 : vector<4x384xf32>, i32 -> vector<4x384xf32>
    %c8_19 = arith.constant 8 : index
    %c384_20 = arith.constant 384 : index
    %25 = vector.load %arg7[%c8_19, %c384_20] : memref<36x768xf32, #tpu.memory_space<vmem>>, vector<4x384xf32>
    tpu.vector_store %arg7[%c8_19, %c384_20], %24 {strides = array<i32>} : memref<36x768xf32, #tpu.memory_space<vmem>>, vector<4x384xf32>,
    %c366_i32_21 = arith.constant 366 : i32
    %26 = tpu.dynamic_rotate %20 by %c366_i32_21 dim 1 : vector<4x384xf32>, i32 -> vector<4x384xf32>
    %c12_22 = arith.constant 12 : index
    %c384_23 = arith.constant 384 : index
    %27 = vector.load %arg7[%c12_22, %c384_23] : memref<36x768xf32, #tpu.memory_space<vmem>>, vector<4x384xf32>
    tpu.vector_store %arg7[%c12_22, %c384_23], %26 {strides = array<i32>} : memref<36x768xf32, #tpu.memory_space<vmem>>, vector<4x384xf32>,
    %c365_i32_24 = arith.constant 365 : i32
    %28 = tpu.dynamic_rotate %20 by %c365_i32_24 dim 1 : vector<4x384xf32>, i32 -> vector<4x384xf32>
    %c16_25 = arith.constant 16 : index
    %c384_26 = arith.constant 384 : index
    %29 = vector.load %arg7[%c16_25, %c384_26] : memref<36x768xf32, #tpu.memory_space<vmem>>, vector<4x384xf32>
    tpu.vector_store %arg7[%c16_25, %c384_26], %28 {strides = array<i32>} : memref<36x768xf32, #tpu.memory_space<vmem>>, vector<4x384xf32>,
    %c364_i32_27 = arith.constant 364 : i32
    %30 = tpu.dynamic_rotate %20 by %c364_i32_27 dim 1 : vector<4x384xf32>, i32 -> vector<4x384xf32>
    %c20_28 = arith.constant 20 : index
    %c384_29 = arith.constant 384 : index
    %31 = vector.load %arg7[%c20_28, %c384_29] : memref<36x768xf32, #tpu.memory_space<vmem>>, vector<4x384xf32>
    tpu.vector_store %arg7[%c20_28, %c384_29], %30 {strides = array<i32>} : memref<36x768xf32, #tpu.memory_space<vmem>>, vector<4x384xf32>,
    %c348_i32_30 = arith.constant 348 : i32
    %32 = tpu.dynamic_rotate %20 by %c348_i32_30 dim 1 : vector<4x384xf32>, i32 -> vector<4x384xf32>
    %c24_31 = arith.constant 24 : index
    %c384_32 = arith.constant 384 : index
    %33 = vector.load %arg7[%c24_31, %c384_32] : memref<36x768xf32, #tpu.memory_space<vmem>>, vector<4x384xf32>
    tpu.vector_store %arg7[%c24_31, %c384_32], %32 {strides = array<i32>} : memref<36x768xf32, #tpu.memory_space<vmem>>, vector<4x384xf32>,
    %c347_i32_33 = arith.constant 347 : i32
    %34 = tpu.dynamic_rotate %20 by %c347_i32_33 dim 1 : vector<4x384xf32>, i32 -> vector<4x384xf32>
    %c28_34 = arith.constant 28 : index
    %c384_35 = arith.constant 384 : index
    %35 = vector.load %arg7[%c28_34, %c384_35] : memref<36x768xf32, #tpu.memory_space<vmem>>, vector<4x384xf32>
    tpu.vector_store %arg7[%c28_34, %c384_35], %34 {strides = array<i32>} : memref<36x768xf32, #tpu.memory_space<vmem>>, vector<4x384xf32>,
    %c346_i32_36 = arith.constant 346 : i32
    %36 = tpu.dynamic_rotate %20 by %c346_i32_36 dim 1 : vector<4x384xf32>, i32 -> vector<4x384xf32>
    %c32_37 = arith.constant 32 : index
    %c384_38 = arith.constant 384 : index
    %37 = vector.load %arg7[%c32_37, %c384_38] : memref<36x768xf32, #tpu.memory_space<vmem>>, vector<4x384xf32>
    tpu.vector_store %arg7[%c32_37, %c384_38], %36 {strides = array<i32>} : memref<36x768xf32, #tpu.memory_space<vmem>>, vector<4x384xf32>,
    %c0_39 = arith.constant 0 : index
    %c0_40 = arith.constant 0 : index
    %38 = vector.load %arg2[%c0_39, %c0_40] : memref<8x36xf32, #tpu.memory_space<vmem>>, vector<8x36xf32>
    %c0_41 = arith.constant 0 : index
    %c0_42 = arith.constant 0 : index
    %39 = vector.load %arg7[%c0_41, %c0_42] : memref<36x768xf32, #tpu.memory_space<vmem>>, vector<36x768xf32>
    %cst = arith.constant dense<0.000000e+00> : vector<8x768xf32>
    %40 = tpu.matmul %38, %39, %cst {dimension_numbers = #tpu.dot_dimension_numbers<[1], [0], [0], [1], [0, 0, 1, 1], [], []>} : vector<8x36xf32>, vector<36x768xf32>, vector<8x768xf32> -> vector<8x768xf32>
    %c0_43 = arith.constant 0 : index
    %c0_44 = arith.constant 0 : index
    %41 = vector.load %arg3[%c0_43, %c0_44] : memref<1x768xf32, #tpu.memory_space<vmem>>, vector<1x768xf32>
    %42 = vector.broadcast %41 : vector<1x768xf32> to vector<8x768xf32>
    %43 = arith.mulf %40, %42 : vector<8x768xf32>
    %cst_45 = arith.constant dense<0.000000e+00> : vector<8xf32>
    %44 = vector.multi_reduction <add>, %43, %cst_45 [1] : vector<8x768xf32> to vector<8xf32>
    %45 = vector.shape_cast %44 : vector<8xf32> to vector<8x1xf32>
    %cst_46 = arith.constant 0.001953125 : f32
    %46 = vector.broadcast %cst_46 : f32 to vector<8x1xf32>
    %47 = arith.mulf %45, %46 : vector<8x1xf32>
    %48 = vector.broadcast %47 : vector<8x1xf32> to vector<8x768xf32>
    %49 = arith.subf %40, %48 : vector<8x768xf32>
    %50 = vector.broadcast %41 : vector<1x768xf32> to vector<8x768xf32>
    %51 = arith.mulf %49, %50 : vector<8x768xf32>
    %52 = arith.mulf %51, %51 : vector<8x768xf32>
    %cst_47 = arith.constant dense<0.000000e+00> : vector<8xf32>
    %53 = vector.multi_reduction <add>, %52, %cst_47 [1] : vector<8x768xf32> to vector<8xf32>
    %54 = vector.shape_cast %53 : vector<8xf32> to vector<8x1xf32>
    %cst_48 = arith.constant 0.001953125 : f32
    %55 = vector.broadcast %cst_48 : f32 to vector<8x1xf32>
    %56 = arith.mulf %54, %55 : vector<8x1xf32>
    %c0_49 = arith.constant 0 : index
    %c0_50 = arith.constant 0 : index
    %57 = vector.load %arg4[%c0_49, %c0_50] : memref<8x1xf32, #tpu.memory_space<vmem>>, vector<8x1xf32>
    %cst_51 = arith.constant 9.99999974E-6 : f32
    %58 = vector.broadcast %cst_51 : f32 to vector<8x1xf32>
    %59 = arith.addf %56, %58 : vector<8x1xf32>
    %60 = math.rsqrt %59 : vector<8x1xf32>
    %61 = arith.mulf %57, %60 : vector<8x1xf32>
    %c0_52 = arith.constant 0 : index
    %c0_53 = arith.constant 0 : index
    %62 = vector.load %arg5[%c0_52, %c0_53] : memref<8x1xf32, #tpu.memory_space<vmem>>, vector<8x1xf32>
    %63 = arith.mulf %47, %61 : vector<8x1xf32>
    %64 = arith.subf %62, %63 : vector<8x1xf32>
    %65 = vector.broadcast %61 : vector<8x1xf32> to vector<8x768xf32>
    %66 = arith.mulf %40, %65 : vector<8x768xf32>
    %67 = vector.broadcast %64 : vector<8x1xf32> to vector<8x768xf32>
    %68 = arith.addf %66, %67 : vector<8x768xf32>
    %cst_54 = arith.constant 0.000000e+00 : f32
    %69 = vector.broadcast %cst_54 : f32 to vector<8x768xf32>
    %70 = arith.maximumf %68, %69 : vector<8x768xf32>
    %71 = vector.extract_strided_slice %70 {offsets = [0, 0], sizes = [8, 384], strides = [1, 1]} : vector<8x768xf32> to vector<8x384xf32>
    %c0_55 = arith.constant 0 : index
    %c0_56 = arith.constant 0 : index
    %c0_57 = arith.constant 0 : index
    %72 = vector.load %arg6[%c0_55, %c0_56, %c0_57] : memref<2x8x384xf32, #tpu.memory_space<vmem>>, vector<1x8x384xf32>
    %73 = vector.shape_cast %72 : vector<1x8x384xf32> to vector<8x384xf32>
    %74 = vector.shape_cast %71 : vector<8x384xf32> to vector<1x8x384xf32>
    tpu.vector_store %arg6[%c0_55, %c0_56, %c0_57], %74 {strides = array<i32>} : memref<2x8x384xf32, #tpu.memory_space<vmem>>, vector<1x8x384xf32>,
    %75 = vector.extract_strided_slice %70 {offsets = [0, 384], sizes = [8, 384], strides = [1, 1]} : vector<8x768xf32> to vector<8x384xf32>
    %c1_58 = arith.constant 1 : index
    %c0_59 = arith.constant 0 : index
    %c0_60 = arith.constant 0 : index
    %76 = vector.load %arg6[%c1_58, %c0_59, %c0_60] : memref<2x8x384xf32, #tpu.memory_space<vmem>>, vector<1x8x384xf32>
    %77 = vector.shape_cast %76 : vector<1x8x384xf32> to vector<8x384xf32>
    %78 = vector.shape_cast %75 : vector<8x384xf32> to vector<1x8x384xf32>
    tpu.vector_store %arg6[%c1_58, %c0_59, %c0_60], %78 {strides = array<i32>} : memref<2x8x384xf32, #tpu.memory_space<vmem>>, vector<1x8x384xf32>,
    return
  }
  func.func @transform_0(%arg0: i32) -> (i32, i32, i32) {
    %c0_i32 = arith.constant 0 : i32
    %c0_i32_0 = arith.constant 0 : i32
    %c0_i32_1 = arith.constant 0 : i32
    %c0_i32_2 = arith.constant 0 : i32
    return %c0_i32, %c0_i32_0, %c0_i32_1 : i32, i32, i32
  }
  func.func @transform_1(%arg0: i32) -> (i32, i32) {
    %c0_i32 = arith.constant 0 : i32
    %c0_i32_0 = arith.constant 0 : i32
    %c0_i32_1 = arith.constant 0 : i32
    return %c0_i32, %c0_i32_0 : i32, i32
  }
  func.func @transform_2(%arg0: i32) -> (i32, i32) {
    %c0_i32 = arith.constant 0 : i32
    %c0_i32_0 = arith.constant 0 : i32
    %c0_i32_1 = arith.constant 0 : i32
    return %c0_i32, %c0_i32_0 : i32, i32
  }
  func.func @transform_3(%arg0: i32) -> (i32, i32) {
    %c0_i32 = arith.constant 0 : i32
    %c0_i32_0 = arith.constant 0 : i32
    %c0_i32_1 = arith.constant 0 : i32
    return %c0_i32, %c0_i32_0 : i32, i32
  }
  func.func @transform_4(%arg0: i32) -> (i32, i32) {
    %c0_i32 = arith.constant 0 : i32
    %c0_i32_0 = arith.constant 0 : i32
    %c0_i32_1 = arith.constant 0 : i32
    return %c0_i32, %c0_i32_0 : i32, i32
  }
  func.func @transform_5(%arg0: i32) -> (i32, i32, i32) {
    %c0_i32 = arith.constant 0 : i32
    %c0_i32_0 = arith.constant 0 : i32
    %c0_i32_1 = arith.constant 0 : i32
    %c0_i32_2 = arith.constant 0 : i32
    return %c0_i32, %c0_i32_0, %c0_i32_1 : i32, i32, i32
  }
}

</mosaic_0001>

<bundles_post_ra>
// kernel: tpu_custom_call.1
= control target key start
LH: loop header
LB: loop body
LE: loop exit
PB: predicated region body
PF: predicated region fallthrough
CT: control target
= control target key end

     0   :  { %10 = vsyncpa [#allocation4], 0  ;;  %s1067_s0 = inlined_call_operand.hbm [shape: f32[2,4,396], index: 0, kind: input, shape index: {}]   ;;  %s1068_s1 = inlined_call_operand.vmem [shape: f32[8,36], index: 1, kind: input, shape index: {}]   ;;  %s1069_s2 = inlined_call_operand.vmem [shape: f32[1,768], index: 2, kind: input, shape index: {}]   ;;  %s1070_s3 = inlined_call_operand.vmem [shape: f32[8,1], index: 3, kind: input, shape index: {}]   ;;  %s1071_s4 = inlined_call_operand.vmem [shape: f32[8,1], index: 4, kind: input, shape index: {}]   ;;  %s1072_s5 = inlined_call_operand.hbm [shape: f32[2,8,384], index: 5, kind: output, shape index: {}]  }
   0x1   :  { %11 = vsyncpa [#allocation5], 0  ;;  %s799_s18 = smov [#allocation3]  }
   0x2   :  { %s17_s19 = sshll.u32 %s799_s18, 4  ;;  %s18_s19 = int_to_ptr.vmem [resolvable:$true] %s17_s19 }
   0x3   :  { %s763_s20 = scalar_lea.vmem %s18_s19, 512  ;;  %p768_p1 = scmp.lt.s32.totalorder %s18_s19, %s18_s19 }
   0x4   :  { %p764_p0 = scmp.ne.s32.totalorder %s18_s19, %s763_s20  ;;  %p769_p2 = scmp.lt.s32.totalorder %s763_s20, %s763_s20 }
   0x6   :  { %p770_p3 = por %p769_p2, %p768_p1 }
   0x8   :  { %p771_p4 = pnand %p770_p3, %p764_p0 }
   0xa   :  { %774 = shalt.err (!%p771_p4)
}
   0xb   :  { %s800_s21 = smov 256   ;;  %s801_s22 = smov 16  }
   0xc   :  { %23 = dma.hbm_to_vmem [thread:$0]  %s1067_s0, 512, %s18_s19, [#allocation4], %s800_s21, %s800_s21, %s801_s22  }
   0xd   :  { %795 = dma.done.wait [#allocation4], 512  }
   0xe   :  { %796 = vsyncadd [#allocation4], 4294966784  ;;  %v36_v0 = vld [vmem:[#allocation3 + $0x8] sm:$0xf]  ;;  %v35_v1 = vld [vmem:[#allocation3] sm:$0xff]  ;;  %s802_s25 = smov 90   ;;  %v49_v7 = vlaneseq }
   0xf   :  { %v186_v2 = vld [vmem:[#allocation3 + $0x10] sm:$0xff]  ;;  %176 = vrot.lane.b32.xlu1 %v36_v0, %s802_s25  ;;  %42 = vst [vmem:[#allocation2 + $0xd8] sm:$0xf] %v36_v0  ;;  %s803_s26 = smov 91   ;;  %40 = vst [vmem:[#allocation2 + $0x80] sm:$0xf] %v35_v1  ;;  %v38_v3 = vcombine.high %v35_v1, %v35_v1 }
  0x10   :  { %154 = vrot.lane.b32.xlu0 %v36_v0, %s803_s26  ;;  %v189_v4 = vcombine.high %v186_v2, %v186_v2  ;;  %191 = vst [vmem:[#allocation2 + $0x70] sm:$0xf] %v186_v2  ;;  %v187_v5 = vld [vmem:[#allocation3 + $0x18] sm:$0xf]  ;;  %s804_s0 = smov 108   ;;  %s805_s27 = smov 92  }
  0x11   :  { %193 = vst [vmem:[#allocation2 + $0x18] sm:$0xf] %v187_v5  ;;  %41 = vst [vmem:[#allocation2] sm:$0xf] %v38_v3  ;;  %s806_s28 = smov 110   ;;  %s807_s29 = smov 109  }
  0x12   :  { %192 = vst [vmem:[#allocation2 + $0x8] sm:$0xf] %v189_v4  ;;  %s808_s30 = smov 127   ;;  %s809_s6 = smov 126   ;;  %v810_v6 = vmov 0.0   ;;  %v899_v8 = vand.u32 127, %v49_v7 }
  0x13   :  { %172 = vrot.lane.b32.xlu1 %v35_v1, %s802_s25  ;;  %444 = vmatprep.mubr.f32.mxu0 %v810_v6  ;;  %vm361_vm4 = vcmask 1043456   ;;  %vm357_vm9 = vcmask 293888  }
  0x14   :  { %150 = vrot.lane.b32.xlu0 %v35_v1, %s803_s26  ;;  %515 = vmatprep.mubr.f32.mxu1 %v810_v6  ;;  %vm178_vm0 = vcmp.lt.s32.totalorder %v899_v8, 90  ;;  %vm156_vm1 = vcmp.lt.s32.totalorder %v899_v8, 91  ;;  %vm121_vm2 = vcmp.lt.s32.totalorder %v899_v8, 108  ;;  %vm143_vm3 = vcmp.lt.s32.totalorder %v899_v8, 92 }
  0x15   :  { %vm86_vm5 = vcmp.lt.s32.totalorder %v899_v8, 110  ;;  %vm108_vm6 = vcmp.lt.s32.totalorder %v899_v8, 109  ;;  %vm51_vm7 = vcmp.lt.s32.totalorder %v899_v8, 127  ;;  %vm73_vm8 = vcmp.lt.s32.totalorder %v899_v8, 126 }
  0x17   :  { %174 = vrot.lane.b32.xlu1 %v38_v3, %s802_s25 }
  0x18   :  { %152 = vrot.lane.b32.xlu0 %v38_v3, %s803_s26 }
  0x1b   :  { %119 = vrot.lane.b32.xlu1 %v36_v0, %s804_s0 }
  0x1c   :  { %117 = vrot.lane.b32.xlu0 %v38_v3, %s804_s0 }
  0x1f   :  { %141 = vrot.lane.b32.xlu1 %v36_v0, %s805_s27 }
  0x20   :  { %139 = vrot.lane.b32.xlu0 %v38_v3, %s805_s27 }
  0x23   :  { %137 = vrot.lane.b32.xlu1 %v35_v1, %s805_s27 }
  0x24   :  { %115 = vrot.lane.b32.xlu0 %v35_v1, %s804_s0 }
  0x27   :  { %84 = vrot.lane.b32.xlu1 %v36_v0, %s806_s28 }
  0x28   :  { %82 = vrot.lane.b32.xlu0 %v38_v3, %s806_s28 }
  0x2b   :  { %106 = vrot.lane.b32.xlu1 %v36_v0, %s807_s29 }
  0x2c   :  { %104 = vrot.lane.b32.xlu0 %v38_v3, %s807_s29 }
  0x2f   :  { %102 = vrot.lane.b32.xlu1 %v35_v1, %s807_s29 }
  0x30   :  { %80 = vrot.lane.b32.xlu0 %v35_v1, %s806_s28 }
  0x33   :  { %47 = vrot.lane.b32.xlu1 %v36_v0, %s808_s30 }
  0x34   :  { %45 = vrot.lane.b32.xlu0 %v38_v3, %s808_s30 }
  0x37   :  { %71 = vrot.lane.b32.xlu1 %v36_v0, %s809_s6 }
  0x38   :  { %69 = vrot.lane.b32.xlu0 %v38_v3, %s809_s6 }
  0x3b   :  { %295 = vrot.lane.b32.xlu1 %v189_v4, %s803_s26 }
  0x3c   :  { %293 = vrot.lane.b32.xlu0 %v186_v2, %s803_s26 }
  0x3f   :  { %316 = vrot.lane.b32.xlu1 %v189_v4, %s802_s25 }
  0x40   :  { %314 = vrot.lane.b32.xlu0 %v186_v2, %s802_s25 }
  0x43   :  { %67 = vrot.lane.b32.xlu1 %v35_v1, %s809_s6 }
  0x44   :  { %43 = vrot.lane.b32.xlu0 %v35_v1, %s808_s30 }
  0x47   :  { %262 = vrot.lane.b32.xlu1 %v189_v4, %s804_s0 }
  0x48   :  { %260 = vrot.lane.b32.xlu0 %v186_v2, %s804_s0 }
  0x4b   :  { %283 = vrot.lane.b32.xlu1 %v189_v4, %s805_s27 }
  0x4c   :  { %281 = vrot.lane.b32.xlu0 %v186_v2, %s805_s27 }
  0x4f   :  { %229 = vrot.lane.b32.xlu1 %v189_v4, %s806_s28 }
  0x50   :  { %227 = vrot.lane.b32.xlu0 %v186_v2, %s806_s28 }
  0x53   :  { %250 = vrot.lane.b32.xlu1 %v189_v4, %s807_s29 }
  0x54   :  { %248 = vrot.lane.b32.xlu0 %v186_v2, %s807_s29 }
  0x57   :  { %318 = vrot.lane.b32.xlu1 %v187_v5, %s802_s25 }
  0x58   :  { %297 = vrot.lane.b32.xlu0 %v187_v5, %s803_s26 }
  0x5b   :  { %196 = vrot.lane.b32.xlu1 %v189_v4, %s808_s30 }
  0x5c   :  { %194 = vrot.lane.b32.xlu0 %v186_v2, %s808_s30 }
  0x5f   :  { %217 = vrot.lane.b32.xlu1 %v189_v4, %s809_s6 }
  0x60   :  { %215 = vrot.lane.b32.xlu0 %v186_v2, %s809_s6 }
  0x63   :  { %285 = vrot.lane.b32.xlu1 %v187_v5, %s805_s27 }
  0x64   :  { %264 = vrot.lane.b32.xlu0 %v187_v5, %s804_s0 }
  0x67   :  { %252 = vrot.lane.b32.xlu1 %v187_v5, %s807_s29 }
  0x68   :  { %231 = vrot.lane.b32.xlu0 %v187_v5, %s806_s28 }
  0x6b   :  { %219 = vrot.lane.b32.xlu1 %v187_v5, %s809_s6 }
  0x6c   :  { %198 = vrot.lane.b32.xlu0 %v187_v5, %s808_s30 }
  0x81   :  { %v177_v9 = vpop.permute.xlu1 %176 }
  0x82   :  { %v155_v10 = vpop.permute.xlu0 %154 }
  0x85   :  { %v173_v11 = vpop.permute.xlu1 %172 }
  0x86   :  { %v151_v12 = vpop.permute.xlu0 %150  ;;  %v181_v13 = vsel %vm178_vm0, %v177_v9, %v173_v11 }
  0x87   :  { %v159_v14 = vsel %vm156_vm1, %v155_v10, %v151_v12  ;;  %184 = vst [vmem:[#allocation2 + $0xd0] sm:$0xf] %v181_v13 }
  0x88   :  { %v165_v15 = vrot.slane %v159_v14, 4 }
  0x89   :  { %v175_v16 = vpop.permute.xlu1 %174 }
  0x8a   :  { %171 = vst [vmem:[#allocation2 + $0x88] sm:$0xf0] %v165_v15  ;;  %v153_v17 = vpop.permute.xlu0 %152  ;;  %v179_v18 = vsel %vm178_vm0, %v175_v16, %v177_v9  ;;  %v180_v19 = vsel %vm178_vm0, %v173_v11, %v175_v16 }
  0x8b   :  { %v157_v20 = vsel %vm156_vm1, %v153_v17, %v155_v10  ;;  %v158_v21 = vsel %vm156_vm1, %v151_v12, %v153_v17  ;;  %182 = vst [vmem:[#allocation2 + $0xc0] sm:$0xf] %v180_v19  ;;  %183 = vst [vmem:[#allocation2 + $0x78] sm:$0xf] %v179_v18 }
  0x8c   :  { %v163_v22 = vrot.slane %v158_v21, 4  ;;  %v164_v23 = vrot.slane %v157_v20, 4 }
  0x8d   :  { %v120_v24 = vpop.permute.xlu1 %119 }
  0x8e   :  { %169 = vst [vmem:[#allocation2 + $0x28] sm:$0xf0] %v163_v22  ;;  %170 = vst [vmem:[#allocation2 + $0xe8] sm:$0xf0] %v164_v23  ;;  %v118_v25 = vpop.permute.xlu0 %117 }
  0x8f   :  { %v122_v26 = vsel %vm121_vm2, %v118_v25, %v120_v24 }
  0x90   :  { %v129_v27 = vrot.slane %v122_v26, 4 }
  0x91   :  { %v142_v28 = vpop.permute.xlu1 %141 }
  0x92   :  { %135 = vst [vmem:[#allocation2 + $0x90] sm:$0xf0] %v129_v27  ;;  %v140_v29 = vpop.permute.xlu0 %139  ;;  %v352_v31 = vld [vmem:[#allocation2 + $0x78] sm:$0xf]  ;;  %v351_v32 = vld [vmem:[#allocation2 + $0xc0] sm:$0xf] }
  0x93   :  { %v144_v30 = vsel %vm143_vm3, %v140_v29, %v142_v28  ;;  %724 = vmatprep.subr.msk.mxu0 %vm361_vm4, %v352_v31  ;;  %v353_v27 = vld [vmem:[#allocation2 + $0xd0] sm:$0xf] }
  0x94   :  { %148 = vst [vmem:[#allocation2 + $0xe8] sm:$0xf] %v144_v30  ;;  %725 = vmatpush1.msk.msra.mxu0 %vm361_vm4, %v351_v32 }
  0x95   :  { %v138_v33 = vpop.permute.xlu1 %137 }
  0x96   :  { %v116_v34 = vpop.permute.xlu0 %115  ;;  %v145_v35 = vsel %vm143_vm3, %v138_v33, %v140_v29  ;;  %v146_v36 = vsel %vm143_vm3, %v142_v28, %v138_v33  ;;  %v984_v33 = vld [vmem:[%s1068_s1] sm:$0xff] }
  0x97   :  { %v123_v37 = vsel %vm121_vm2, %v116_v34, %v118_v25  ;;  %v124_v38 = vsel %vm121_vm2, %v120_v24, %v116_v34  ;;  %147 = vst [vmem:[#allocation2 + $0x28] sm:$0xf] %v145_v35  ;;  %149 = vst [vmem:[#allocation2 + $0x88] sm:$0xf] %v146_v36 }
  0x98   :  { %v128_v39 = vrot.slane %v123_v37, 4  ;;  %v130_v40 = vrot.slane %v124_v38, 4 }
  0x99   :  { %v85_v41 = vpop.permute.xlu1 %84 }
  0x9a   :  { %134 = vst [vmem:[#allocation2 + $0x60] sm:$0xf0] %v128_v39  ;;  %136 = vst [vmem:[#allocation2 + $0x20] sm:$0xf0] %v130_v40  ;;  %v83_v42 = vpop.permute.xlu0 %82 }
  0x9b   :  { %v87_v43 = vsel %vm86_vm5, %v83_v42, %v85_v41  ;;  %v346_v44 = vld [vmem:[#allocation2 + $0xe8] sm:$0xff] }
  0x9c   :  { %v94_v45 = vrot.slane %v87_v43, 4  ;;  %404 = vmatprep.subr.mxu0 %v346_v44 }
  0x9d   :  { %v107_v46 = vpop.permute.xlu1 %106 }
  0x9e   :  { %100 = vst [vmem:[#allocation2 + $0x98] sm:$0xf0] %v94_v45  ;;  %v105_v47 = vpop.permute.xlu0 %104  ;;  %v345_v49 = vld [vmem:[#allocation2 + $0x28] sm:$0xff] }
  0x9f   :  { %v109_v48 = vsel %vm108_vm6, %v105_v47, %v107_v46  ;;  %405 = vmatpush1.msra.mxu0 %v345_v49  ;;  %v347_v43 = vld [vmem:[#allocation2 + $0x88] sm:$0xff] }
  0xa0   :  { %113 = vst [vmem:[#allocation2 + $0x90] sm:$0xf] %v109_v48 }
  0xa1   :  { %v103_v50 = vpop.permute.xlu1 %102 }
  0xa2   :  { %v81_v51 = vpop.permute.xlu0 %80  ;;  %v110_v52 = vsel %vm108_vm6, %v103_v50, %v105_v47  ;;  %v111_v53 = vsel %vm108_vm6, %v107_v46, %v103_v50 }
  0xa3   :  { %v88_v54 = vsel %vm86_vm5, %v81_v51, %v83_v42  ;;  %v89_v55 = vsel %vm86_vm5, %v85_v41, %v81_v51  ;;  %112 = vst [vmem:[#allocation2 + $0x60] sm:$0xf] %v110_v52  ;;  %114 = vst [vmem:[#allocation2 + $0x20] sm:$0xf] %v111_v53 }
  0xa4   :  { %v93_v56 = vrot.slane %v88_v54, 4  ;;  %v95_v57 = vrot.slane %v89_v55, 4 }
  0xa5   :  { %v48_v58 = vpop.permute.xlu1 %47 }
  0xa6   :  { %99 = vst [vmem:[#allocation2 + $0x30] sm:$0xf0] %v93_v56  ;;  %101 = vst [vmem:[#allocation2 + $0xc8] sm:$0xf0] %v95_v57  ;;  %v46_v59 = vpop.permute.xlu0 %45 }
  0xa7   :  { %v52_v60 = vsel %vm51_vm7, %v46_v59, %v48_v58  ;;  %v340_v61 = vld [vmem:[#allocation2 + $0x90] sm:$0xff] }
  0xa8   :  { %v59_v62 = vrot.slane %v52_v60, 4  ;;  %406 = vmatprep.subr.mxu0 %v340_v61 }
  0xa9   :  { %v72_v63 = vpop.permute.xlu1 %71 }
  0xaa   :  { %65 = vst [vmem:[#allocation2] sm:$0xf0] %v59_v62  ;;  %v70_v0 = vpop.permute.xlu0 %69  ;;  %v339_v2 = vld [vmem:[#allocation2 + $0x60] sm:$0xff] }
  0xab   :  { %v74_v1 = vsel %vm73_vm8, %v70_v0, %v72_v63  ;;  %407 = vmatpush1.msra.mxu0 %v339_v2  ;;  %v341_v56 = vld [vmem:[#allocation2 + $0x20] sm:$0xff] }
  0xac   :  { %78 = vst [vmem:[#allocation2 + $0x98] sm:$0xf] %v74_v1 }
  0xad   :  { %v951_v3 = vpop.permute.xlu1 %295 }
  0xae   :  { %v953_v4 = vpop.permute.xlu0 %293 }
  0xaf   :  { %v300_v5 = vsel %vm156_vm1, %v953_v4, %v951_v3 }
  0xb0   :  { %v305_v9 = vrot.slane %v300_v5, 4 }
  0xb1   :  { %v317_v10 = vpop.permute.xlu1 %316  ;;  %v328_v32 = vld [vmem:[#allocation2] sm:$0xff] }
  0xb2   :  { %311 = vst [vmem:[#allocation2 + $0xa0] sm:$0xf0] %v305_v9  ;;  %v315_v11 = vpop.permute.xlu0 %314 }
  0xb3   :  { %v321_v12 = vsel %vm178_vm0, %v315_v11, %v317_v10  ;;  %v334_v13 = vld [vmem:[#allocation2 + $0x98] sm:$0xff] }
  0xb4   :  { %323 = vst [vmem:[#allocation2 + $0xb0] sm:$0xf] %v321_v12  ;;  %408 = vmatprep.subr.mxu0 %v334_v13 }
  0xb5   :  { %v68_v14 = vpop.permute.xlu1 %67 }
  0xb6   :  { %v44_v15 = vpop.permute.xlu0 %43  ;;  %v75_v16 = vsel %vm73_vm8, %v68_v14, %v70_v0  ;;  %v76_v17 = vsel %vm73_vm8, %v72_v63, %v68_v14 }
  0xb7   :  { %v53_v18 = vsel %vm51_vm7, %v44_v15, %v46_v59  ;;  %v54_v19 = vsel %vm51_vm7, %v48_v58, %v44_v15  ;;  %77 = vst [vmem:[#allocation2 + $0x30] sm:$0xf] %v75_v16  ;;  %79 = vst [vmem:[#allocation2 + $0xc8] sm:$0xf] %v76_v17 }
  0xb8   :  { %v58_v20 = vrot.slane %v53_v18, 4  ;;  %v60_v21 = vrot.slane %v54_v19, 4 }
  0xb9   :  { %v969_v22 = vpop.permute.xlu1 %262 }
  0xba   :  { %64 = vst [vmem:[#allocation2 + $0x80] sm:$0xf0] %v58_v20  ;;  %66 = vst [vmem:[#allocation2 + $0xd8] sm:$0xf0] %v60_v21  ;;  %v971_v23 = vpop.permute.xlu0 %260 }
  0xbb   :  { %v267_v24 = vsel %vm121_vm2, %v971_v23, %v969_v22  ;;  %v354_v25 = vld [vmem:[#allocation2 + $0xb0] sm:$0xf] }
  0xbc   :  { %v272_v26 = vrot.slane %v267_v24, 4  ;;  %727 = vmatprep.subr.msk.mxu1 %vm361_vm4, %v354_v25 }
  0xbd   :  { %728 = vmatpush1.msk.msra.mxu1 %vm361_vm4, %v353_v27  ;;  %v284_v28 = vpop.permute.xlu1 %283 }
  0xbe   :  { %278 = vst [vmem:[#allocation2 + $0x40] sm:$0xf0] %v272_v26  ;;  %v282_v29 = vpop.permute.xlu0 %281  ;;  %v333_v31 = vld [vmem:[#allocation2 + $0x30] sm:$0xff]  ;;  %v335_v18 = vld [vmem:[#allocation2 + $0xc8] sm:$0xff] }
  0xbf   :  { %v288_v30 = vsel %vm143_vm3, %v282_v29, %v284_v28  ;;  %409 = vmatpush1.msra.mxu0 %v333_v31 }
  0xc0   :  { %290 = vst [vmem:[#allocation2 + $0xa0] sm:$0xf] %v288_v30  ;;  %410 = vmatprep.subr.mxu0 %v328_v32 }
  0xc1   :  { %v327_v34 = vld [vmem:[#allocation2 + $0x80] sm:$0xff]  ;;  %v230_v35 = vpop.permute.xlu1 %229 }
  0xc2   :  { %v228_v36 = vpop.permute.xlu0 %227  ;;  %411 = vmatpush1.msra.mxu0 %v327_v34 }
  0xc3   :  { %v234_v37 = vsel %vm86_vm5, %v228_v36, %v230_v35  ;;  %726 = vmatmul.mubr.msk.f32.vlgmr.msra.gmra.mxu0 %vm357_vm9, %v984_v33 }
  0xc4   :  { %v239_v38 = vrot.slane %v234_v37, 4  ;;  %586 = vmatprep.mubr.f32.mxu0 %v810_v6  ;;  %v596_v37 = vshrl.u32 %v49_v7, 7 }
  0xc5   :  { %v251_v39 = vpop.permute.xlu1 %250 }
  0xc6   :  { %245 = vst [vmem:[#allocation2 + $0xa8] sm:$0xf0] %v239_v38  ;;  %v249_v40 = vpop.permute.xlu0 %248  ;;  %v597_v38 = vsub.s32 0, %v596_v37 }
  0xc7   :  { %v255_v41 = vsel %vm108_vm6, %v249_v40, %v251_v39  ;;  %v348_v42 = vld [vmem:[#allocation2 + $0xa0] sm:$0xff] }
  0xc8   :  { %257 = vst [vmem:[#allocation2 + $0x40] sm:$0xf] %v255_v41  ;;  %475 = vmatprep.subr.mxu1 %v348_v42  ;;  %v593_v41 = vld [vmem:[%s1069_s2] sm:$0x3f] }
  0xc9   :  { %476 = vmatpush1.msra.mxu1 %v347_v43  ;;  %v319_v44 = vpop.permute.xlu1 %318  ;;  %v598_v42 = vrot.slane %v593_v41, %v597_v38 }
  0xca   :  { %v298_v45 = vpop.permute.xlu0 %297  ;;  %v320_v46 = vsel %vm178_vm0, %v317_v10, %v319_v44  ;;  %v322_v47 = vsel %vm178_vm0, %v319_v44, %v315_v11  ;;  %v605_v44 = vsub.s32 2, %v596_v37 }
  0xcb   :  { %v299_v6 = vsel %vm156_vm1, %v951_v3, %v298_v45  ;;  %v301_v48 = vsel %vm156_vm1, %v298_v45, %v953_v4  ;;  %324 = vst [vmem:[#allocation2 + $0xe0] sm:$0xf] %v320_v46  ;;  %325 = vst [vmem:[#allocation2 + $0x38] sm:$0xf] %v322_v47 }
  0xcc   :  { %v306_v49 = vrot.slane %v299_v6, 4  ;;  %v307_v50 = vrot.slane %v301_v48, 4  ;;  %v609_v6 = vsub.s32 3, %v596_v37 }
  0xcd   :  { %v197_v51 = vpop.permute.xlu1 %196 }
  0xce   :  { %312 = vst [vmem:[#allocation2 + $0xb8] sm:$0xf0] %v306_v49  ;;  %313 = vst [vmem:[#allocation2 + $0x50] sm:$0xf0] %v307_v50  ;;  %v195_v52 = vpop.permute.xlu0 %194  ;;  %v610_v50 = vrot.slane %v593_v41, %v609_v6 }
  0xcf   :  { %v201_v53 = vsel %vm51_vm7, %v195_v52, %v197_v51  ;;  %v342_v54 = vld [vmem:[#allocation2 + $0x40] sm:$0xff] }
  0xd0   :  { %v206_v55 = vrot.slane %v201_v53, 4  ;;  %477 = vmatprep.subr.mxu1 %v342_v54  ;;  %v617_v53 = vsub.s32 5, %v596_v37 }
  0xd1   :  { %478 = vmatpush1.msra.mxu1 %v341_v56  ;;  %v218_v57 = vpop.permute.xlu1 %217 }
  0xd2   :  { %212 = vst [vmem:[#allocation2 + $0x70] sm:$0xf0] %v206_v55  ;;  %v216_v58 = vpop.permute.xlu0 %215  ;;  %v356_v60 = vld [vmem:[#allocation2 + $0x38] sm:$0xf]  ;;  %v355_v61 = vld [vmem:[#allocation2 + $0xe0] sm:$0xf] }
  0xd3   :  { %v222_v59 = vsel %vm73_vm8, %v216_v58, %v218_v57  ;;  %730 = vmatprep.subr.msk.mxu0 %vm361_vm4, %v356_v60 }
  0xd4   :  { %224 = vst [vmem:[#allocation2 + $0xa8] sm:$0xf] %v222_v59  ;;  %731 = vmatpush1.msk.msra.mxu0 %vm361_vm4, %v355_v61 }
  0xd5   :  { %v286_v62 = vpop.permute.xlu1 %285 }
  0xd6   :  { %v265_v63 = vpop.permute.xlu0 %264  ;;  %v287_v0 = vsel %vm143_vm3, %v284_v28, %v286_v62  ;;  %v289_v1 = vsel %vm143_vm3, %v286_v62, %v282_v29 }
  0xd7   :  { %v266_v2 = vsel %vm121_vm2, %v969_v22, %v265_v63  ;;  %v268_v3 = vsel %vm121_vm2, %v265_v63, %v971_v23  ;;  %291 = vst [vmem:[#allocation2 + $0xb8] sm:$0xf] %v287_v0  ;;  %292 = vst [vmem:[#allocation2 + $0x50] sm:$0xf] %v289_v1  ;;  %v329_v22 = vld [vmem:[#allocation2 + $0xd8] sm:$0xff] }
  0xd8   :  { %v273_v4 = vrot.slane %v266_v2, 4  ;;  %v274_v5 = vrot.slane %v268_v3, 4 }
  0xd9   :  { %v253_v9 = vpop.permute.xlu1 %252  ;;  %v330_v19 = vld [vmem:[#allocation2 + $0x70] sm:$0xff] }
  0xda   :  { %279 = vst [vmem:[#allocation2 + $0x48] sm:$0xf0] %v273_v4  ;;  %280 = vst [vmem:[#allocation2 + $0x58] sm:$0xf0] %v274_v5  ;;  %v232_v10 = vpop.permute.xlu0 %231  ;;  %v254_v11 = vsel %vm108_vm6, %v251_v39, %v253_v9  ;;  %v256_v12 = vsel %vm108_vm6, %v253_v9, %v249_v40  ;;  %v601_v39 = vsub.s32 1, %v596_v37 }
  0xdb   :  { %v233_v13 = vsel %vm86_vm5, %v230_v35, %v232_v10  ;;  %v235_v14 = vsel %vm86_vm5, %v232_v10, %v228_v36  ;;  %v336_v15 = vld [vmem:[#allocation2 + $0xa8] sm:$0xff]  ;;  %258 = vst [vmem:[#allocation2 + $0x48] sm:$0xf] %v254_v11  ;;  %259 = vst [vmem:[#allocation2 + $0x58] sm:$0xf] %v256_v12 }
  0xdc   :  { %v240_v16 = vrot.slane %v233_v13, 4  ;;  %v241_v17 = vrot.slane %v235_v14, 4  ;;  %479 = vmatprep.subr.mxu1 %v336_v15  ;;  %v602_v43 = vrot.slane %v593_v41, %v601_v39 }
  0xdd   :  { %480 = vmatpush1.msra.mxu1 %v335_v18  ;;  %v220_v20 = vpop.permute.xlu1 %219 }
  0xde   :  { %246 = vst [vmem:[#allocation2 + $0x10] sm:$0xf0] %v240_v16  ;;  %247 = vst [vmem:[#allocation2 + $0x68] sm:$0xf0] %v241_v17  ;;  %481 = vmatprep.subr.mxu1 %v330_v19  ;;  %v199_v21 = vpop.permute.xlu0 %198  ;;  %v221_v23 = vsel %vm73_vm8, %v218_v57, %v220_v20  ;;  %v223_v24 = vsel %vm73_vm8, %v220_v20, %v216_v58  ;;  %v350_v27 = vld [vmem:[#allocation2 + $0x50] sm:$0xff]  ;;  %v349_v28 = vld [vmem:[#allocation2 + $0xb8] sm:$0xff]  ;;  %v618_v57 = vrot.slane %v593_v41, %v617_v53 }
  0xdf   :  { %v200_v25 = vsel %vm51_vm7, %v197_v51, %v199_v21  ;;  %v202_v26 = vsel %vm51_vm7, %v199_v21, %v195_v52  ;;  %482 = vmatpush1.msra.mxu1 %v329_v22  ;;  %225 = vst [vmem:[#allocation2 + $0x10] sm:$0xf] %v221_v23  ;;  %226 = vst [vmem:[#allocation2 + $0x68] sm:$0xf] %v223_v24  ;;  %546 = vmatprep.subr.mxu0 %v350_v27  ;;  %v613_v51 = vsub.s32 4, %v596_v37 }
  0xe0   :  { %v207_v29 = vrot.slane %v200_v25, 4  ;;  %v208_v30 = vrot.slane %v202_v26, 4  ;;  %729 = vmatmul.mubr.msk.f32.vlgmr.msra.gmra.mxu1 %vm357_vm9, %v984_v33  ;;  %547 = vmatpush1.msra.mxu0 %v349_v28 }
  0xe1   :  { %v614_v56 = vrot.slane %v593_v41, %v613_v51 }
  0xe2   :  { %213 = vst [vmem:[#allocation2 + $0x8] sm:$0xf0] %v207_v29  ;;  %214 = vst [vmem:[#allocation2 + $0x18] sm:$0xf0] %v208_v30  ;;  %v344_v31 = vld [vmem:[#allocation2 + $0x58] sm:$0xff]  ;;  %v343_v32 = vld [vmem:[#allocation2 + $0x48] sm:$0xff] }
  0xe3   :  { %548 = vmatprep.subr.mxu0 %v344_v31  ;;  %v811_v29 = vmov 0  }
  0xe4   :  { %549 = vmatpush1.msra.mxu0 %v343_v32  ;;  %749 = vset.pattern.permute.xlu0 %v811_v29 }
  0xe5   :  { %750 = vset.pattern.permute.xlu1 %v811_v29 }
  0xe6   :  { %v338_v8 = vld [vmem:[#allocation2 + $0x68] sm:$0xff]  ;;  %v337_v34 = vld [vmem:[#allocation2 + $0x10] sm:$0xff] }
  0xe7   :  { %550 = vmatprep.subr.mxu0 %v338_v8  ;;  %v665_v8 = vld [vmem:[%s1070_s3] sm:$0xff]  ;;  %s812_s3 = smov [#allocation6]  }
  0xe8   :  { %551 = vmatpush1.msra.mxu0 %v337_v34  ;;  %s712_s13 = sshll.u32 %s812_s3, 4  ;;  %s713_s13 = int_to_ptr.vmem [resolvable:$true] %s712_s13 }
  0xe9   :  { %v332_v35 = vld [vmem:[#allocation2 + $0x18] sm:$0xff]  ;;  %v331_v36 = vld [vmem:[#allocation2 + $0x8] sm:$0xff]  ;;  %p780_p6 = scmp.lt.s32.totalorder %s713_s13, %s713_s13 }
  0xea   :  { %552 = vmatprep.subr.mxu0 %v332_v35 }
  0xeb   :  { %553 = vmatpush1.msra.mxu0 %v331_v36  ;;  %v669_v36 = vld [vmem:[%s1071_s4] sm:$0xff]  ;;  %s775_s4 = scalar_lea.vmem %s713_s13, 768 }
  0xec   :  { %732 = vmatmul.mubr.msk.f32.vlgmr.msra.gmra.mxu0 %vm357_vm9, %v984_v33  ;;  %v606_v33 = vrot.slane %v593_v41, %v605_v44  ;;  %p776_p5 = scmp.ne.s32.totalorder %s713_s13, %s775_s4  ;;  %p781_p7 = scmp.lt.s32.totalorder %s775_s4, %s775_s4 }
  0xee   :  { %p782_p8 = por %p781_p7, %p780_p6 }
  0xf0   :  { %p783_p9 = pnand %p782_p8, %p776_p5 }
 0x183   :  { %v1040_v40 = vpop.f32.mrf.mxu0 }
 0x184   :  { %v625_v46 = vmul.f32 %v598_v42, %v1040_v40 }
 0x185   :  { %v1045_v45 = vpop.f32.mrf.mxu0 }
 0x186   :  { %v626_v47 = vmul.f32 %v602_v43, %v1045_v45 }
 0x188   :  { %v631_v48 = vadd.f32 %v626_v47, %v625_v46 }
 0x1a0   :  { %v1049_v7 = vpop.f32.mrf.mxu1 }
 0x1a1   :  { %v627_v49 = vmul.f32 %v606_v33, %v1049_v7 }
 0x1a2   :  { %v519_v52 = vpop.f32.mrf.mxu1 }
 0x1a3   :  { %v632_v54 = vadd.f32 %v631_v48, %v627_v49  ;;  %v628_v55 = vmul.f32 %v610_v50, %v519_v52 }
 0x1a5   :  { %v633_v59 = vadd.f32 %v632_v54, %v628_v55 }
 0x1ac   :  { %v588_v58 = vpop.f32.mrf.mxu0 }
 0x1ad   :  { %v629_v60 = vmul.f32 %v614_v56, %v588_v58 }
 0x1ae   :  { %v590_v61 = vpop.f32.mrf.mxu0 }
 0x1af   :  { %v630_v62 = vmul.f32 %v618_v57, %v590_v61  ;;  %v634_v63 = vadd.f32 %v633_v59, %v629_v60 }
 0x1b1   :  { %v635_v0 = vadd.f32 %v634_v63, %v630_v62 }
 0x1b3   :  { %636 = vadd.xlane.f32.xlu0 %v635_v0 }
 0x23c   :  { %v637_v1 = vpop.xlane.xlu0 %636 }
 0x23d   :  { %v638_v2 = vmul.f32 0.001953125, %v637_v1 }
 0x23f   :  { %v639_v3 = vsub.f32 %v1040_v40, %v638_v2  ;;  %v640_v4 = vsub.f32 %v1045_v45, %v638_v2  ;;  %v641_v5 = vsub.f32 %v1049_v7, %v638_v2  ;;  %v642_v9 = vsub.f32 %v519_v52, %v638_v2 }
 0x240   :  { %v643_v10 = vsub.f32 %v588_v58, %v638_v2  ;;  %v644_v14 = vsub.f32 %v590_v61, %v638_v2 }
 0x241   :  { %v645_v11 = vmul.f32 %v639_v3, %v598_v42  ;;  %v646_v12 = vmul.f32 %v640_v4, %v602_v43  ;;  %v647_v13 = vmul.f32 %v641_v5, %v606_v33  ;;  %v648_v15 = vmul.f32 %v642_v9, %v610_v50 }
 0x242   :  { %v649_v18 = vmul.f32 %v643_v10, %v614_v56  ;;  %v650_v21 = vmul.f32 %v644_v14, %v618_v57 }
 0x243   :  { %v651_v16 = vmul.f32 %v645_v11, %v645_v11  ;;  %v652_v17 = vmul.f32 %v646_v12, %v646_v12  ;;  %v653_v19 = vmul.f32 %v647_v13, %v647_v13  ;;  %v654_v22 = vmul.f32 %v648_v15, %v648_v15 }
 0x244   :  { %v655_v24 = vmul.f32 %v649_v18, %v649_v18  ;;  %v656_v26 = vmul.f32 %v650_v21, %v650_v21 }
 0x245   :  { %v657_v20 = vadd.f32 %v652_v17, %v651_v16 }
 0x247   :  { %v658_v23 = vadd.f32 %v657_v20, %v653_v19 }
 0x249   :  { %v659_v25 = vadd.f32 %v658_v23, %v654_v22 }
 0x24b   :  { %v660_v27 = vadd.f32 %v659_v25, %v655_v24 }
 0x24d   :  { %v661_v28 = vadd.f32 %v660_v27, %v656_v26 }
 0x24f   :  { %662 = vadd.xlane.f32.xlu1 %v661_v28 }
 0x2d8   :  { %v663_v30 = vpop.xlane.xlu1 %662 }
 0x2d9   :  { %v664_v31 = vmul.f32 0.001953125, %v663_v30 }
 0x2db   :  { %v666_v32 = vadd.f32 1e-05, %v664_v31 }
 0x2dd   :  { %753 = vrsqrt.f32 %v666_v32 }
 0x2ea   :  { %v754_v34 = vpop.eup %753 }
 0x2eb   :  { %v668_v35 = vmul.f32 %v754_v34, %v665_v8 }
 0x2ed   :  { %674 = vperm.xlu0 %749, %v668_v35   ;;  %v670_v37 = vmul.f32 %v668_v35, %v638_v2 }
 0x2ef   :  { %v671_v38 = vsub.f32 %v669_v36, %v670_v37 }
 0x2f1   :  { %685 = vperm.xlu1 %750, %v671_v38  }
 0x368   :  { %v675_v39 = vpop.permute.xlu0 %674 }
 0x369   :  { %v677_v41 = vmul.f32 %v675_v39, %v1040_v40  ;;  %v678_v42 = vmul.f32 %v675_v39, %v1045_v45  ;;  %v679_v43 = vmul.f32 %v675_v39, %v1049_v7  ;;  %v680_v44 = vmul.f32 %v675_v39, %v519_v52 }
 0x36a   :  { %v681_v46 = vmul.f32 %v675_v39, %v588_v58  ;;  %v682_v47 = vmul.f32 %v675_v39, %v590_v61 }
 0x36c   :  { %v686_v33 = vpop.permute.xlu1 %685 }
 0x36d   :  { %v688_v6 = vadd.f32 %v686_v33, %v677_v41  ;;  %v689_v48 = vadd.f32 %v686_v33, %v678_v42  ;;  %v690_v49 = vadd.f32 %v686_v33, %v679_v43  ;;  %v691_v50 = vadd.f32 %v686_v33, %v680_v44 }
 0x36e   :  { %v692_v51 = vadd.f32 %v686_v33, %v681_v46  ;;  %v693_v53 = vadd.f32 %v686_v33, %v682_v47 }
 0x36f   :  { %v694_v54 = vmax.f32 %v688_v6, 0.0  ;;  %v695_v55 = vmax.f32 %v689_v48, 0.0  ;;  %v696_v56 = vmax.f32 %v690_v49, 0.0  ;;  %v697_v40 = vmax.f32 %v691_v50, 0.0 }
 0x370   :  { %v698_v45 = vmax.f32 %v692_v51, 0.0  ;;  %v699_v57 = vmax.f32 %v693_v53, 0.0 }
 0x371   :  { %700 = vst [vmem:[#allocation6] sm:$0xff] %v694_v54  ;;  %701 = vst [vmem:[#allocation6 + $0x8] sm:$0xff] %v695_v55 }
 0x372   :  { %702 = vst [vmem:[#allocation6 + $0x10] sm:$0xff] %v696_v56  ;;  %704 = vst [vmem:[#allocation6 + $0x18] sm:$0xff] %v697_v40 }
 0x373   :  { %705 = vst [vmem:[#allocation6 + $0x20] sm:$0xff] %v698_v45  ;;  %706 = vst [vmem:[#allocation6 + $0x28] sm:$0xff] %v699_v57 }
 0x374   :  { %786 = shalt.err (!%p783_p9)
}
 0x375   :  { %s813_s14 = smov 384   ;;  %s814_s15 = smov 24  }
 0x376   :  { %718 = dma.vmem_to_hbm [thread:$0]  %s713_s13, 768, %s1072_s5, [#allocation5], %s813_s14, %s813_s14, %s814_s15  }
 0x377   :  { %797 = dma.done.wait [#allocation5], 768  }
 0x378   :  { %798 = vsyncadd [#allocation5], 4294966528 }
 0x379   :  { %722 = vsyncpa [#allocation4], 1 }
 0x37a   :  { %723 = vsyncpa [#allocation5], 1 }

</bundles_post_ra>
